<compile_context>
chip_gen: v5e
topology: v5e:2x2
jax: 0.10.0
libtpu: 0.0.40
codegen_flags: <defaults>
</compile_context>

<pallas_src>
import math

import jax
import jax.numpy as jnp
from jax.experimental import pallas as pl
from jax.experimental.pallas import tpu as pltpu

_EPS = 1e-5                      # torch.nn.LayerNorm default
_VMEM_LIMIT = 32 * 1024 * 1024   # explicit scoped-VMEM budget (safe on v5e/v6e/v7x)


def _ln_rows_f32(x_f32, g_f32, b_f32):
    """LayerNorm over the last axis of an f32 tile (biased variance, affine)."""
    mean = jnp.mean(x_f32, axis=-1, keepdims=True)
    centered = x_f32 - mean
    var = jnp.mean(centered * centered, axis=-1, keepdims=True)  # biased, like torch
    inv = jax.lax.rsqrt(var + _EPS)                              # EUP rsqrt (free slot)
    return centered * inv * g_f32 + b_f32


# ----------------------- Standalone tiled LayerNorm -------------------------
def _layernorm_kernel(x_ref, g_ref, b_ref, o_ref):
    # x_ref: (rows_tile, D); g_ref, b_ref: (1, D)
    y = _ln_rows_f32(x_ref[...].astype(jnp.float32),
                     g_ref[...].astype(jnp.float32),
                     b_ref[...].astype(jnp.float32))
    o_ref[...] = y.astype(o_ref.dtype)


def layernorm_pallas(x, gamma, beta, *, block_rows=512):
    """LayerNorm over the last axis of x (any leading dims), row-tiled and pipelined."""
    orig_shape = x.shape
    d = orig_shape[-1]
    rows = math.prod(orig_shape[:-1]) if len(orig_shape) > 1 else 1
    x2 = x.reshape(rows, d)
    g2 = gamma.reshape(1, d)
    b2 = beta.reshape(1, d)

    # Row tile: full rows for small inputs, otherwise 512-row tiles (multiple of 8).
    tr = rows if rows <= block_rows else block_rows
    grid = (pl.cdiv(rows, tr),)

    out = pl.pallas_call(
        _layernorm_kernel,
        out_shape=jax.ShapeDtypeStruct((rows, d), x.dtype),
        grid_spec=pltpu.PrefetchScalarGridSpec(
            num_scalar_prefetch=0,
            grid=grid,
            in_specs=[
                pl.BlockSpec((tr, d), lambda i: (i, 0)),
                pl.BlockSpec((1, d), lambda i: (0, 0)),   # gamma stays resident
                pl.BlockSpec((1, d), lambda i: (0, 0)),   # beta stays resident
            ],
            out_specs=pl.BlockSpec((tr, d), lambda i: (i, 0)),
        ),
        compiler_params=pltpu.CompilerParams(
            dimension_semantics=("parallel",),
            vmem_limit_bytes=_VMEM_LIMIT),
    )(x2, g2, b2)
    return out.reshape(orig_shape)


# -------------------- Fused LayerNorm + matmul (x_ln @ W) -------------------
def _ln_matmul_kernel(x_ref, g_ref, b_ref, w_ref, o_ref):
    # x_ref: (tm, K) — full K so the LN reduction sees the whole row.
    y = _ln_rows_f32(x_ref[...].astype(jnp.float32),
                     g_ref[...].astype(jnp.float32),
                     b_ref[...].astype(jnp.float32))
    o_ref[...] = jnp.dot(y.astype(w_ref.dtype), w_ref[...],
                         preferred_element_type=jnp.float32).astype(o_ref.dtype)


def fused_layernorm_matmul(x, gamma, beta, w, *, tm=256, tn=256):
    """Computes LayerNorm(x) @ w in ONE pallas_call (LN fused as a matmul prologue).

    The normalized axis K (= LayerNorm dim) stays whole inside each block so the
    per-row reduction is exact; M and N are tiled and marked 'parallel'.
    """
    *lead, d = x.shape
    rows = math.prod(lead) if lead else 1
    k, n = w.shape
    assert k == d, "weight K must equal LayerNorm dim"

    x2 = x.reshape(rows, d)
    g2 = gamma.reshape(1, d)
    b2 = beta.reshape(1, d)

    tm = rows if rows <= tm else tm      # 256 is a multiple of 8, MXU-friendly
    tn = n if n <= tn else tn            # 256 is a multiple of 128
    grid = (pl.cdiv(rows, tm), pl.cdiv(n, tn))

    out = pl.pallas_call(
        _ln_matmul_kernel,
        out_shape=jax.ShapeDtypeStruct((rows, n), x.dtype),
        grid_spec=pltpu.PrefetchScalarGridSpec(
            num_scalar_prefetch=0,
            grid=grid,
            in_specs=[
                pl.BlockSpec((tm, d), lambda i, j: (i, 0)),
                pl.BlockSpec((1, d), lambda i, j: (0, 0)),
                pl.BlockSpec((1, d), lambda i, j: (0, 0)),
                pl.BlockSpec((d, tn), lambda i, j: (0, j)),
            ],
            out_specs=pl.BlockSpec((tm, tn), lambda i, j: (i, j)),
        ),
        compiler_params=pltpu.CompilerParams(
            dimension_semantics=("parallel", "parallel"),
            vmem_limit_bytes=_VMEM_LIMIT),
    )(x2, g2, b2, w)
    return out.reshape(*lead, n)


# --------------------------------- PreNorm ----------------------------------
class PreNormPallas:
    """JAX/Pallas equivalent of the PyTorch PreNorm module.

    If the wrapped `fn` exposes `call_fused(x, gamma, beta, ...)`, the LayerNorm is
    fused into fn's own Pallas kernels (no HBM round-trip of the normalized tensors).
    Otherwise the generic path runs the standalone tiled LayerNorm kernel and then fn.
    """

    def __init__(self, dim, fn, context_dim=None, key=None):
        self.fn = fn
        self.dim = dim
        self.context_dim = context_dim
        key = jax.random.PRNGKey(0) if key is None else key
        k1, k2, k3, k4 = jax.random.split(key, 4)
        # Deterministic (non-trivial) affine parameters for the LayerNorms.
        self.gamma = 1.0 + 0.1 * jax.random.normal(k1, (dim,), jnp.float32)
        self.beta = 0.1 * jax.random.normal(k2, (dim,), jnp.float32)
        if context_dim is not None:
            self.gamma_ctx = 1.0 + 0.1 * jax.random.normal(k3, (context_dim,), jnp.float32)
            self.beta_ctx = 0.1 * jax.random.normal(k4, (context_dim,), jnp.float32)
        else:
            self.gamma_ctx = None
            self.beta_ctx = None

    def __call__(self, x, **kwargs):
        # Fast path: LN fused into fn's matmul kernels.
        if hasattr(self.fn, "call_fused"):
            if self.gamma_ctx is not None:
                return self.fn.call_fused(x, self.gamma, self.beta,
                                          gamma_ctx=self.gamma_ctx,
                                          beta_ctx=self.beta_ctx, **kwargs)
            return self.fn.call_fused(x, self.gamma, self.beta, **kwargs)
        # Generic path: tiled standalone LayerNorm kernels, then arbitrary fn.
        x = layernorm_pallas(x, self.gamma, self.beta)
        if self.gamma_ctx is not None:
            kwargs = dict(kwargs)
            kwargs["context"] = layernorm_pallas(kwargs["context"],
                                                 self.gamma_ctx, self.beta_ctx)
        return self.fn(x, **kwargs)


# ---------------------------------- Demo fn ---------------------------------
class DemoLinearFn:
    """fn(x, context) = x @ Wx + mean_over_seq(context @ Wc).

    __call__ takes already-normalized inputs (generic PreNorm path / reference math);
    call_fused takes raw inputs + LN params and fuses the LayerNorm into the matmuls.
    """

    def __init__(self, dim, context_dim, key):
        k1, k2 = jax.random.split(key)
        self.wx = 0.1 * jax.random.normal(k1, (dim, dim), jnp.float32)
        self.wc = 0.1 * jax.random.normal(k2, (context_dim, dim), jnp.float32)

    def __call__(self, x, context):
        xp = jnp.einsum("bnd,de->bne", x, self.wx)
        cp = jnp.einsum("bnd,de->bne", context, self.wc)
        return xp + jnp.mean(cp, axis=1, keepdims=True)

    def call_fused(self, x, gamma, beta, *, context, gamma_ctx, beta_ctx):
        xp = fused_layernorm_matmul(x, gamma, beta, self.wx)
        cp = fused_layernorm_matmul(context, gamma_ctx, beta_ctx, self.wc)
        # TODO(synk): the tiny cross-sequence mean stays in plain JAX (arbitrary fn glue).
        return xp + jnp.mean(cp, axis=1, keepdims=True)


# ---------------------------------- Main ------------------------------------
if __name__ == "__main__":
    batch, seq, dim = 2, 8, 32
    seq_ctx, context_dim = 8, 16

    key = jax.random.PRNGKey(0)
    kx, kc, kp, kf = jax.random.split(key, 4)

    x = jax.random.normal(kx, (batch, seq, dim), jnp.float32)
    context = jax.random.normal(kc, (batch, seq_ctx, context_dim), jnp.float32)

    fn = DemoLinearFn(dim, context_dim, kf)
    prenorm = PreNormPallas(dim, fn, context_dim=context_dim, key=kp)

    # Fused path (LN folded into the matmul kernels).
    out = jax.block_until_ready(prenorm(x, context=context))

    # Pure-JAX reference (same math as torch.nn.LayerNorm).
    def ref_ln(v, g, b):
        m = jnp.mean(v, axis=-1, keepdims=True)
        var = jnp.mean((v - m) ** 2, axis=-1, keepdims=True)
        return (v - m) * jax.lax.rsqrt(var + _EPS) * g + b

    ref = fn(ref_ln(x, prenorm.gamma, prenorm.beta),
             context=ref_ln(context, prenorm.gamma_ctx, prenorm.beta_ctx))
    assert jnp.allclose(out, ref, atol=1e-4, rtol=1e-4), "fused path mismatch vs reference"

    # Also exercise the standalone tiled LayerNorm kernel (generic PreNorm path).
    ln_x = jax.block_until_ready(layernorm_pallas(x, prenorm.gamma, prenorm.beta))
    assert jnp.allclose(ln_x, ref_ln(x, prenorm.gamma, prenorm.beta),
                        atol=1e-4, rtol=1e-4), "standalone LayerNorm mismatch"

    print("KERNEL_OK")
</pallas_src>

<mosaic_0001>
module attributes {stable_mosaic.version = 11 : i64} {
  func.func @_ln_matmul_kernel(%arg0: i32, %arg1: i32, %arg2: memref<16x32xf32, #tpu.memory_space<vmem>>, %arg3: memref<1x32xf32, #tpu.memory_space<vmem>>, %arg4: memref<1x32xf32, #tpu.memory_space<vmem>>, %arg5: memref<32x32xf32, #tpu.memory_space<vmem>>, %arg6: memref<16x32xf32, #tpu.memory_space<vmem>>) attributes {dimension_semantics = [#tpu.dimension_semantics<parallel>, #tpu.dimension_semantics<parallel>], iteration_bounds = array<i64: 1, 1>, scalar_prefetch = 0 : i64, scratch_operands = 0 : i64, tpu.core_type = #tpu.core_type<tc>, window_params = [{transform_indices = @transform_0, window_bounds = array<i64: 16, 32>}, {pipeline_mode = #tpu.pipeline_mode<synchronous>, transform_indices = @transform_1, window_bounds = array<i64: 1, 32>}, {pipeline_mode = #tpu.pipeline_mode<synchronous>, transform_indices = @transform_2, window_bounds = array<i64: 1, 32>}, {transform_indices = @transform_3, window_bounds = array<i64: 32, 32>}, {transform_indices = @transform_4, window_bounds = array<i64: 16, 32>}]} {
    %c0 = arith.constant 0 : index
    %c0_0 = arith.constant 0 : index
    %0 = vector.load %arg2[%c0, %c0_0] : memref<16x32xf32, #tpu.memory_space<vmem>>, vector<16x32xf32>
    %c0_1 = arith.constant 0 : index
    %c0_2 = arith.constant 0 : index
    %1 = vector.load %arg3[%c0_1, %c0_2] : memref<1x32xf32, #tpu.memory_space<vmem>>, vector<1x32xf32>
    %c0_3 = arith.constant 0 : index
    %c0_4 = arith.constant 0 : index
    %2 = vector.load %arg4[%c0_3, %c0_4] : memref<1x32xf32, #tpu.memory_space<vmem>>, vector<1x32xf32>
    %cst = arith.constant dense<0.000000e+00> : vector<16xf32>
    %3 = vector.multi_reduction <add>, %0, %cst [1] : vector<16x32xf32> to vector<16xf32>
    %4 = vector.shape_cast %3 : vector<16xf32> to vector<16x1xf32>
    %cst_5 = arith.constant 3.200000e+01 : f32
    %5 = vector.broadcast %cst_5 : f32 to vector<16x1xf32>
    %6 = arith.divf %4, %5 : vector<16x1xf32>
    %7 = vector.broadcast %6 : vector<16x1xf32> to vector<16x32xf32>
    %8 = arith.subf %0, %7 : vector<16x32xf32>
    %9 = arith.mulf %8, %8 : vector<16x32xf32>
    %cst_6 = arith.constant dense<0.000000e+00> : vector<16xf32>
    %10 = vector.multi_reduction <add>, %9, %cst_6 [1] : vector<16x32xf32> to vector<16xf32>
    %11 = vector.shape_cast %10 : vector<16xf32> to vector<16x1xf32>
    %cst_7 = arith.constant 3.200000e+01 : f32
    %12 = vector.broadcast %cst_7 : f32 to vector<16x1xf32>
    %13 = arith.divf %11, %12 : vector<16x1xf32>
    %cst_8 = arith.constant 9.99999974E-6 : f32
    %14 = vector.broadcast %cst_8 : f32 to vector<16x1xf32>
    %15 = arith.addf %13, %14 : vector<16x1xf32>
    %16 = math.rsqrt %15 : vector<16x1xf32>
    %17 = vector.broadcast %16 : vector<16x1xf32> to vector<16x32xf32>
    %18 = arith.mulf %8, %17 : vector<16x32xf32>
    %19 = vector.broadcast %1 : vector<1x32xf32> to vector<16x32xf32>
    %20 = arith.mulf %18, %19 : vector<16x32xf32>
    %21 = vector.broadcast %2 : vector<1x32xf32> to vector<16x32xf32>
    %22 = arith.addf %20, %21 : vector<16x32xf32>
    %c0_9 = arith.constant 0 : index
    %c0_10 = arith.constant 0 : index
    %23 = vector.load %arg5[%c0_9, %c0_10] : memref<32x32xf32, #tpu.memory_space<vmem>>, vector<32x32xf32>
    %cst_11 = arith.constant dense<0.000000e+00> : vector<16x32xf32>
    %24 = tpu.matmul %22, %23, %cst_11 {dimension_numbers = #tpu.dot_dimension_numbers<[1], [0], [0], [1], [0, 0, 1, 1], [], []>} : vector<16x32xf32>, vector<32x32xf32>, vector<16x32xf32> -> vector<16x32xf32>
    %c0_12 = arith.constant 0 : index
    %c0_13 = arith.constant 0 : index
    %25 = vector.load %arg6[%c0_12, %c0_13] : memref<16x32xf32, #tpu.memory_space<vmem>>, vector<16x32xf32>
    tpu.vector_store %arg6[%c0_12, %c0_13], %24 {strides = array<i32>} : memref<16x32xf32, #tpu.memory_space<vmem>>, vector<16x32xf32>,
    return
  }
  func.func @transform_0(%arg0: i32, %arg1: i32) -> (i32, i32) {
    %c0_i32 = arith.constant 0 : i32
    %c0_i32_0 = arith.constant 0 : i32
    return %arg0, %c0_i32 : i32, i32
  }
  func.func @transform_1(%arg0: i32, %arg1: i32) -> (i32, i32) {
    %c0_i32 = arith.constant 0 : i32
    %c0_i32_0 = arith.constant 0 : i32
    %c0_i32_1 = arith.constant 0 : i32
    return %c0_i32, %c0_i32_0 : i32, i32
  }
  func.func @transform_2(%arg0: i32, %arg1: i32) -> (i32, i32) {
    %c0_i32 = arith.constant 0 : i32
    %c0_i32_0 = arith.constant 0 : i32
    %c0_i32_1 = arith.constant 0 : i32
    return %c0_i32, %c0_i32_0 : i32, i32
  }
  func.func @transform_3(%arg0: i32, %arg1: i32) -> (i32, i32) {
    %c0_i32 = arith.constant 0 : i32
    %c0_i32_0 = arith.constant 0 : i32
    return %c0_i32, %arg1 : i32, i32
  }
  func.func @transform_4(%arg0: i32, %arg1: i32) -> (i32, i32) {
    %c0_i32 = arith.constant 0 : i32
    return %arg0, %arg1 : i32, i32
  }
}

</mosaic_0001>

<bundles_post_ra>
// kernel: tpu_custom_call.1
= control target key start
LH: loop header
LB: loop body
LE: loop exit
PB: predicated region body
PF: predicated region fallthrough
CT: control target
= control target key end

     0   :  { %9 = vsyncpa [#allocation3], 0  ;;  %s371_s0 = inlined_call_operand.hbm [shape: f32[16,32], index: 0, kind: input, shape index: {}]   ;;  %s372_s1 = inlined_call_operand.hbm [shape: f32[1,32], index: 1, kind: input, shape index: {}]   ;;  %s373_s2 = inlined_call_operand.vmem [shape: f32[1,32], index: 2, kind: input, shape index: {}]   ;;  %s374_s3 = inlined_call_operand.hbm [shape: f32[32,32], index: 3, kind: input, shape index: {}]   ;;  %s375_s4 = inlined_call_operand.hbm [shape: f32[16,32], index: 4, kind: output, shape index: {}]  }
   0x1   :  { %10 = vsyncpa [#allocation6], 0  ;;  %s30_s17 = sshll.u32 %s372_s1, 4  ;;  %s31_s17 = int_to_ptr.hbm [resolvable:$true] %s30_s17 }
   0x2   :  { %11 = vsyncpa [#allocation4], 0  ;;  %s307_s18 = smov [#allocation5]   ;;  %s16_s22 = sshll.u32 %s371_s0, 4  ;;  %s17_s22 = int_to_ptr.hbm [resolvable:$true] %s16_s22 }
   0x3   :  { %s32_s19 = sshll.u32 %s307_s18, 4  ;;  %s308_s23 = smov [#allocation2]   ;;  %s33_s19 = int_to_ptr.vmem [resolvable:$true] %s32_s19 }
   0x4   :  { %35 = dma.hbm_to_vmem [thread:$0]  %s31_s17, 16, %s33_s19, [#allocation6]  }
   0x5   :  { %s18_s24 = sshll.u32 %s308_s23, 4  ;;  %s309_s25 = smov 128   ;;  %s19_s24 = int_to_ptr.vmem [resolvable:$true] %s18_s24 }
   0x6   :  { %s310_s26 = smov 8   ;;  %s42_s28 = sshll.u32 %s374_s3, 4  ;;  %s43_s28 = int_to_ptr.hbm [resolvable:$true] %s42_s28 }
   0x7   :  { %24 = dma.hbm_to_vmem [thread:$0]  %s17_s22, 256, %s19_s24, [#allocation3], %s309_s25, %s309_s25, %s310_s26  }
   0x8   :  { %s311_s29 = smov [#allocation7]  }
   0x9   :  { %s44_s30 = sshll.u32 %s311_s29, 4  ;;  %s45_s30 = int_to_ptr.vmem [resolvable:$true] %s44_s30 }
   0xa   :  { %50 = dma.hbm_to_vmem [thread:$0]  %s43_s28, 512, %s45_s30, [#allocation6], %s309_s25, %s309_s25, %s310_s26  }
   0xb   :  { %301 = dma.done.wait [#allocation3], 256  }
   0xc   :  { %302 = vsyncadd [#allocation3], 4294967040 }
   0xd   :  { %303 = dma.done.wait [#allocation6], 528  }
   0xe   :  { %304 = vsyncadd [#allocation6], 4294966768  ;;  %vm67_vm0 = vcmask 261120   ;;  %v63_v0 = vld [vmem:[#allocation2] sm:$0xff]  ;;  %v64_v2 = vld [vmem:[#allocation2 + $0x8] sm:$0xff]  ;;  %v312_v4 = vmov 32.0  }
   0xf   :  { %v68_v1 = vsel %vm67_vm0, %v63_v0, 0.0  ;;  %v71_v3 = vsel %vm67_vm0, %v64_v2, 0.0  ;;  %199 = vrcp.f32 %v312_v4  ;;  %v132_v21 = vld [vmem:[#allocation7 + $0x18] sm:$0xff]  ;;  %v131_v22 = vld [vmem:[#allocation7 + $0x10] sm:$0xff]  ;;  %v130_v23 = vld [vmem:[#allocation7 + $0x8] sm:$0xff]  ;;  %s170_s8 = sshll.u32 %s375_s4, 4  ;;  %s171_s8 = int_to_ptr.hbm [resolvable:$true] %s170_s8 }
  0x10   :  { %69 = vadd.xlane.f32.xlu0 %v68_v1  ;;  %151 = vmatpush.msra.mxu0 %v132_v21  ;;  %v129_v24 = vld [vmem:[#allocation7] sm:$0xff]  ;;  %v197_v39 = vld [vmem:[#allocation5] ss:$0 sm:$0xff]  ;;  %v198_v43 = vld [vmem:[%s373_s2] ss:$0 sm:$0xff]  ;;  %s313_s2 = smov [#allocation8]  }
  0x11   :  { %186 = vmatpush.msra.mxu1 %v132_v21  ;;  %s168_s5 = sshll.u32 %s313_s2, 4  ;;  %s169_s5 = int_to_ptr.vmem [resolvable:$true] %s168_s5 }
  0x12   :  { %152 = vmatpush.msra.mxu0 %v131_v22 }
  0x13   :  { %187 = vmatpush.msra.mxu1 %v131_v22 }
  0x14   :  { %153 = vmatpush.msra.mxu0 %v130_v23 }
  0x15   :  { %v200_v5 = vpop.eup %199  ;;  %188 = vmatpush.msra.mxu1 %v130_v23 }
  0x16   :  { %v75_v6 = vmul.f32 32.0, %v200_v5  ;;  %vm79_vm1 = vweird.f32 %v200_v5  ;;  %154 = vmatpush.msra.mxu0 %v129_v24 }
  0x17   :  { %189 = vmatpush.msra.mxu1 %v129_v24 }
  0x18   :  { %72 = vadd.xlane.f32.xlu0 %v71_v3  ;;  %v76_v7 = vsub.f32 1.0, %v75_v6 }
  0x1a   :  { %v77_v8 = vmul.f32 %v200_v5, %v76_v7 }
  0x1c   :  { %v78_v9 = vadd.f32 %v200_v5, %v77_v8 }
  0x1e   :  { %v80_v10 = vsel %vm79_vm1, %v200_v5, %v78_v9 }
  0x83   :  { %v70_v11 = vpop.xlane.xlu0 %69 }
  0x84   :  { %v81_v12 = vmul.f32 %v80_v10, %v70_v11 }
  0x86   :  { %v83_v13 = vsub.f32 %v63_v0, %v81_v12 }
  0x88   :  { %v85_v14 = vmul.f32 %v83_v13, %v83_v13 }
  0x8a   :  { %v87_v15 = vsel %vm67_vm0, %v85_v14, 0.0 }
  0x8b   :  { %88 = vadd.xlane.f32.xlu1 %v87_v15  ;;  %v73_v16 = vpop.xlane.xlu0 %72 }
  0x8c   :  { %v82_v17 = vmul.f32 %v80_v10, %v73_v16 }
  0x8e   :  { %v84_v18 = vsub.f32 %v64_v2, %v82_v17 }
  0x90   :  { %v86_v19 = vmul.f32 %v84_v18, %v84_v18 }
  0x92   :  { %v90_v20 = vsel %vm67_vm0, %v86_v19, 0.0 }
  0x93   :  { %91 = vadd.xlane.f32.xlu1 %v90_v20 }
  0xfe   :  { %v89_v25 = vpop.xlane.xlu1 %88 }
  0xff   :  { %v93_v26 = vmul.f32 %v89_v25, %v80_v10 }
 0x101   :  { %v95_v27 = vadd.f32 1e-05, %v93_v26 }
 0x103   :  { %201 = vrsqrt.f32 %v95_v27  ;;  %vm103_vm3 = vweird.f32 %v95_v27 }
 0x106   :  { %v92_v28 = vpop.xlane.xlu1 %91 }
 0x107   :  { %v94_v29 = vmul.f32 %v92_v28, %v80_v10 }
 0x109   :  { %v202_v30 = vpop.eup %201  ;;  %v96_v31 = vadd.f32 1e-05, %v94_v29 }
 0x10a   :  { %v98_v32 = vmul.f32 %v202_v30, %v95_v27  ;;  %vm104_vm2 = vweird.f32 %v202_v30 }
 0x10b   :  { %203 = vrsqrt.f32 %v96_v31  ;;  %vm105_vm4 = vmor %vm103_vm3, %vm104_vm2  ;;  %vm113_vm6 = vweird.f32 %v96_v31 }
 0x10c   :  { %v99_v33 = vmul.f32 %v202_v30, %v98_v32 }
 0x10e   :  { %v100_v34 = vmul.f32 0.5, %v99_v33 }
 0x110   :  { %v101_v35 = vsub.f32 1.5, %v100_v34 }
 0x111   :  { %v204_v36 = vpop.eup %203 }
 0x112   :  { %v102_v37 = vmul.f32 %v202_v30, %v101_v35  ;;  %v108_v38 = vmul.f32 %v204_v36, %v96_v31  ;;  %vm114_vm5 = vweird.f32 %v204_v36 }
 0x113   :  { %vm115_vm7 = vmor %vm113_vm6, %vm114_vm5 }
 0x114   :  { %v106_v40 = vsel %vm105_vm4, %v202_v30, %v102_v37  ;;  %v109_v41 = vmul.f32 %v204_v36, %v108_v38 }
 0x115   :  { %v117_v42 = vmul.f32 %v106_v40, %v83_v13 }
 0x116   :  { %v110_v44 = vmul.f32 0.5, %v109_v41 }
 0x117   :  { %v122_v45 = vmul.f32 %v197_v39, %v117_v42 }
 0x118   :  { %v111_v46 = vsub.f32 1.5, %v110_v44 }
 0x119   :  { %v127_v47 = vadd.f32 %v198_v43, %v122_v45 }
 0x11a   :  { %v112_v48 = vmul.f32 %v204_v36, %v111_v46 }
 0x11b   :  { %184 = vmatmul.msk.f32.vlgmr.msra.gmra.mxu0 %vm67_vm0, %v127_v47 }
 0x11c   :  { %v116_v49 = vsel %vm115_vm7, %v204_v36, %v112_v48 }
 0x11d   :  { %v118_v50 = vmul.f32 %v116_v49, %v84_v18 }
 0x11f   :  { %v123_v51 = vmul.f32 %v197_v39, %v118_v50 }
 0x121   :  { %v128_v52 = vadd.f32 %v198_v43, %v123_v51 }
 0x123   :  { %185 = vmatmul.msk.f32.vlgmr.msra.gmra.mxu1 %vm67_vm0, %v128_v52 }
 0x198   :  { %v156_v53 = vpop.f32.mrf.mxu0 }
 0x199   :  { %162 = vst.msk [vmem:[#allocation8] sm:$0xff] %vm67_vm0, %v156_v53 }
 0x1a0   :  { %v159_v54 = vpop.f32.mrf.mxu1 }
 0x1a1   :  { %163 = vst.msk [vmem:[#allocation8 + $0x8] sm:$0xff] %vm67_vm0, %v159_v54 }
 0x1a2   :  { %176 = dma.vmem_to_hbm [thread:$0]  %s169_s5, 256, %s171_s8, [#allocation4], %s309_s25, %s309_s25, %s310_s26  }
 0x1a3   :  { %305 = dma.done.wait [#allocation4], 256  }
 0x1a4   :  { %306 = vsyncadd [#allocation4], 4294967040 }
 0x1a5   :  { %181 = vsyncpa [#allocation3], 1 }
 0x1a6   :  { %182 = vsyncpa [#allocation6], 1 }
 0x1a7   :  { %183 = vsyncpa [#allocation4], 1 }

</bundles_post_ra>
